<compile_context>
chip_gen: v7x
topology: tpu7x:2x2x1
jax: 0.10.0
libtpu: 0.0.40
codegen_flags: <defaults>
</compile_context>

<pallas_src>
import math
import functools

import jax
import jax.numpy as jnp
from jax import lax
from jax.experimental import pallas as pl
from jax.experimental.pallas import tpu as pltpu


_INV_SQRT2 = 1.0 / math.sqrt(2.0)


def _gelu_exact(x):
    """Exact (erf) GELU — matches torch.nn.GELU() default."""
    return 0.5 * x * (1.0 + lax.erf(x * _INV_SQRT2))


# -----------------------------------------------------------------------------
# Kernels
# -----------------------------------------------------------------------------
def _ffn_fused_kernel(x_ref, w1_ref, b1_ref, w2_ref, b2_ref, o_ref):
    """Whole FFN for one token tile; W1/W2 are VMEM-resident (no hidden loop)."""
    h = jnp.dot(x_ref[...], w1_ref[...], preferred_element_type=jnp.float32)
    h = _gelu_exact(h + b1_ref[...])                       # bias + GELU in fp32
    out = jnp.dot(h.astype(w2_ref.dtype), w2_ref[...],
                  preferred_element_type=jnp.float32)
    o_ref[...] = (out + b2_ref[...]).astype(o_ref.dtype)


def _ffn_tiled_kernel(x_ref, w1_ref, b1_ref, w2_ref, b2_ref, o_ref, acc_ref):
    """One (token-tile, hidden-tile) step; fp32 accumulator in VMEM scratch."""
    hh = pl.program_id(1)

    @pl.when(hh == 0)
    def _():
        acc_ref[...] = jnp.zeros_like(acc_ref)

    h = jnp.dot(x_ref[...], w1_ref[...], preferred_element_type=jnp.float32)
    h = _gelu_exact(h + b1_ref[...])
    acc_ref[...] += jnp.dot(h.astype(w2_ref.dtype), w2_ref[...],
                            preferred_element_type=jnp.float32)

    @pl.when(hh == pl.num_programs(1) - 1)
    def _():
        o_ref[...] = (acc_ref[...] + b2_ref[...]).astype(o_ref.dtype)


# -----------------------------------------------------------------------------
# Wrapper helpers
# -----------------------------------------------------------------------------
def _round_up(x, m):
    return -(-x // m) * m


def _default_vmem_limit():
    """Per-generation scoped-VMEM budget with headroom for compiler scratch."""
    try:
        cap = int(pltpu.get_tpu_info().vmem_capacity_bytes)
    except Exception:
        cap = 64 * 1024 * 1024  # conservative (v7x-sized) fallback
    # Leave >=16 MiB headroom; never request more than ~100 MiB even on
    # 128 MiB parts (v5e/v6e), and never less than 32 MiB.
    return max(min(cap - 16 * 1024 * 1024, 100 * 1024 * 1024), 32 * 1024 * 1024)


def _choose_token_tile(n, target):
    """Token tile (multiple of 8) + padded N; keep >=2 tiles when possible so
    the 'parallel' axis feeds both v7x TensorCores."""
    tn = _round_up(min(target, _round_up(n, 8)), 8)
    if _round_up(n, 8) > 8 and -(-n // tn) < 2:
        tn = _round_up(-(-n // 2), 8)
    n_pad = _round_up(n, tn)
    return tn, n_pad


# -----------------------------------------------------------------------------
# Public entry point
# -----------------------------------------------------------------------------
@functools.partial(
    jax.jit, static_argnames=("compute_dtype", "tn", "th", "vmem_limit_bytes"))
def feed_forward(x, w1, b1, w2, b2, *, compute_dtype=jnp.bfloat16,
                 tn=None, th=None, vmem_limit_bytes=None):
    """FeedForward forward pass (eval mode: dropouts are identity).

    x : (..., D)   activations
    w1: (D, H)     first Linear weight (math layout, H = 4*D)
    b1: (H,)       first Linear bias
    w2: (H, D)     second Linear weight
    b2: (D,)       second Linear bias

    compute_dtype: MXU operand dtype (default bf16 with fp32 accumulation;
                   pass jnp.float32 for exact parity with a fp32 reference).
    """
    orig_shape = x.shape
    out_dtype = x.dtype
    D = x.shape[-1]
    H = w1.shape[-1]

    if compute_dtype is None:
        compute_dtype = x.dtype
    cd = jnp.dtype(compute_dtype)
    cd_bytes = cd.itemsize
    out_bytes = jnp.dtype(out_dtype).itemsize

    if vmem_limit_bytes is None:
        vmem_limit_bytes = _default_vmem_limit()
    vmem_limit_bytes = int(vmem_limit_bytes)
    budget = int(vmem_limit_bytes * 0.8)

    x2 = x.reshape(-1, D)
    N = x2.shape[0]

    # Token tile target: big enough to amortize weight streaming (v6e wants
    # ~512+ in bf16); smaller in fp32 to keep the working set sane.
    tn_target = tn if tn is not None else (512 if cd_bytes <= 2 else 256)
    tn_, n_pad = _choose_token_tile(N, tn_target)

    # ---- Decide fused (weights-resident) vs tiled (hidden-reduction) path ----
    def fused_bytes(t):
        return (2 * t * D * cd_bytes          # x tile (double buffered)
                + 2 * t * D * out_bytes       # out tile (double buffered)
                + 2 * 2 * D * H * cd_bytes    # W1 + W2 (conservatively 2x)
                + t * H * 4                   # fp32 hidden intermediate
                + (H + D) * 4)                # fp32 biases

    use_fused = False
    if th is None:  # caller did not force hidden tiling
        t = tn_
        while True:
            if fused_bytes(t) <= budget:
                tn_, n_pad = _choose_token_tile(N, t)
                use_fused = True
                break
            if t <= 8:
                break
            t = _round_up(max(t // 2, 8), 8)

    if not use_fused:
        H_pad0 = _round_up(H, 128)
        if th is not None:
            th_ = th
        else:
            th_ = (512 if H_pad0 % 512 == 0 else
                   256 if H_pad0 % 256 == 0 else 128)
        th_ = min(th_, H_pad0)

        def tiled_bytes(t, s):
            return (2 * t * D * cd_bytes      # x tile
                    + 2 * D * s * cd_bytes    # W1 tile
                    + 2 * s * D * cd_bytes    # W2 tile
                    + 2 * t * D * out_bytes   # out tile
                    + t * D * 4               # fp32 accumulator scratch
                    + t * s * 4               # fp32 hidden intermediate
                    + (s + D) * 4)            # fp32 biases

        # Shrink the hidden (reduction) tile first, then the token tile.
        while tiled_bytes(tn_, th_) > budget and th_ > 128:
            th_ //= 2
        while tiled_bytes(tn_, th_) > budget and tn_ > 8:
            tn_ = _round_up(max(tn_ // 2, 8), 8)
        n_pad = _round_up(N, tn_)
        H_pad = _round_up(H, th_)

    # ---- Cast to compute dtype / pad ----------------------------------------
    # bf16 operands: ~2-4x MXU throughput + half the weight DMA bytes.
    # Biases stay fp32 and are added to the fp32 accumulators.
    x2c = x2.astype(cd)
    w1c = w1.astype(cd)
    w2c = w2.astype(cd)
    b1f = b1.astype(jnp.float32).reshape(1, H)
    b2f = b2.astype(jnp.float32).reshape(1, D)

    if n_pad != N:
        x2c = jnp.pad(x2c, ((0, n_pad - N), (0, 0)))

    if not use_fused and H_pad != H:
        # Zero-padding is exact: GELU(0 + 0) = 0 and zero W2 rows contribute 0.
        w1c = jnp.pad(w1c, ((0, 0), (0, H_pad - H)))
        b1f = jnp.pad(b1f, ((0, 0), (0, H_pad - H)))
        w2c = jnp.pad(w2c, ((0, H_pad - H), (0, 0)))

    # ---- Cost estimate (advisory for XLA scheduling) -------------------------
    cost = pl.CostEstimate(
        flops=4 * n_pad * D * H,
        transcendentals=n_pad * H,
        bytes_accessed=(x2c.size * cd_bytes + w1c.size * cd_bytes
                        + w2c.size * cd_bytes + b1f.size * 4 + b2f.size * 4
                        + n_pad * D * out_bytes),
    )

    # ---- pallas_call ----------------------------------------------------------
    if use_fused:
        out = pl.pallas_call(
            _ffn_fused_kernel,
            out_shape=jax.ShapeDtypeStruct((n_pad, D), out_dtype),
            grid_spec=pltpu.PrefetchScalarGridSpec(
                num_scalar_prefetch=0,
                grid=(n_pad // tn_,),
                in_specs=[
                    pl.BlockSpec((tn_, D), lambda n: (n, 0)),
                    # Weights / biases are VMEM-resident: constant index map,
                    # DMA'd from HBM exactly once.
                    pl.BlockSpec((D, H), lambda n: (0, 0)),
                    pl.BlockSpec((1, H), lambda n: (0, 0)),
                    pl.BlockSpec((H, D), lambda n: (0, 0)),
                    pl.BlockSpec((1, D), lambda n: (0, 0)),
                ],
                out_specs=pl.BlockSpec((tn_, D), lambda n: (n, 0)),
            ),
            compiler_params=pltpu.CompilerParams(
                dimension_semantics=("parallel",),
                vmem_limit_bytes=vmem_limit_bytes,
            ),
            cost_estimate=cost,
        )(x2c, w1c, b1f, w2c, b2f)
    else:
        out = pl.pallas_call(
            _ffn_tiled_kernel,
            out_shape=jax.ShapeDtypeStruct((n_pad, D), out_dtype),
            grid_spec=pltpu.PrefetchScalarGridSpec(
                num_scalar_prefetch=0,
                grid=(n_pad // tn_, H_pad // th_),
                in_specs=[
                    # x tile resident across the whole hidden (reduction) loop.
                    pl.BlockSpec((tn_, D), lambda n, h: (n, 0)),
                    # Weight / bias tiles depend only on the hidden index.
                    pl.BlockSpec((D, th_), lambda n, h: (0, h)),
                    pl.BlockSpec((1, th_), lambda n, h: (0, h)),
                    pl.BlockSpec((th_, D), lambda n, h: (h, 0)),
                    pl.BlockSpec((1, D), lambda n, h: (0, 0)),
                ],
                # Same output block across the hidden axis -> accumulator-resident.
                out_specs=pl.BlockSpec((tn_, D), lambda n, h: (n, 0)),
                scratch_shapes=[pltpu.VMEM((tn_, D), jnp.float32)],
            ),
            compiler_params=pltpu.CompilerParams(
                dimension_semantics=("parallel", "arbitrary"),
                vmem_limit_bytes=vmem_limit_bytes,
            ),
            cost_estimate=cost,
        )(x2c, w1c, b1f, w2c, b2f)

    if n_pad != N:
        out = out[:N]
    return out.reshape(orig_shape)


def feed_forward_reference(x, w1, b1, w2, b2):
    h = jnp.dot(x, w1) + b1
    h = _gelu_exact(h)
    return jnp.dot(h, w2) + b2


if __name__ == "__main__":
    # Small shapes consistent with the module: n_embed=32 -> hidden=128,
    # batch=2, seq=8 (16 tokens total).
    B, T, D = 2, 8, 32
    H = 4 * D

    key = jax.random.PRNGKey(0)
    kx, kw1, kb1, kw2, kb2, kx2, kw3, kb3, kw4, kb4 = jax.random.split(key, 10)

    # torch nn.Linear init: U(-1/sqrt(in_features), 1/sqrt(in_features)).
    bound1 = 1.0 / math.sqrt(D)
    bound2 = 1.0 / math.sqrt(H)
    w1 = jax.random.uniform(kw1, (D, H), jnp.float32, minval=-bound1, maxval=bound1)
    b1 = jax.random.uniform(kb1, (H,), jnp.float32, minval=-bound1, maxval=bound1)
    w2 = jax.random.uniform(kw2, (H, D), jnp.float32, minval=-bound2, maxval=bound2)
    b2 = jax.random.uniform(kb2, (D,), jnp.float32, minval=-bound2, maxval=bound2)
    x = jax.random.normal(kx, (B, T, D), jnp.float32)

    ref = jax.block_until_ready(feed_forward_reference(x, w1, b1, w2, b2))

    # 1) Default performance path: bf16 operands, fp32 accumulation, fused
    #    weights-resident kernel.
    out_bf16 = jax.block_until_ready(feed_forward(x, w1, b1, w2, b2))
    assert out_bf16.shape == (B, T, D), out_bf16.shape
    assert out_bf16.dtype == x.dtype
    err_bf16 = float(jnp.max(jnp.abs(out_bf16 - ref)))
    assert err_bf16 < 3e-2, err_bf16

    # 2) Exact-parity path: fp32 end to end, tight tolerance.
    out_f32 = jax.block_until_ready(
        feed_forward(x, w1, b1, w2, b2, compute_dtype=jnp.float32))
    err_f32 = float(jnp.max(jnp.abs(out_f32 - ref)))
    assert jnp.allclose(out_f32, ref, atol=2e-5, rtol=2e-5), err_f32

    # 3) Tiled/accumulator path with ragged token count and a multi-step
    #    hidden reduction (forced via th=128).
    D2, H2 = 64, 256
    bnd1 = 1.0 / math.sqrt(D2)
    bnd2 = 1.0 / math.sqrt(H2)
    w3 = jax.random.uniform(kw3, (D2, H2), jnp.float32, minval=-bnd1, maxval=bnd1)
    b3 = jax.random.uniform(kb3, (H2,), jnp.float32, minval=-bnd1, maxval=bnd1)
    w4 = jax.random.uniform(kw4, (H2, D2), jnp.float32, minval=-bnd2, maxval=bnd2)
    b4 = jax.random.uniform(kb4, (D2,), jnp.float32, minval=-bnd2, maxval=bnd2)
    x3 = jax.random.normal(kx2, (3, 7, D2), jnp.float32)   # 21 tokens (ragged)

    out_tiled = jax.block_until_ready(
        feed_forward(x3, w3, b3, w4, b4, compute_dtype=jnp.float32, th=128))
    ref_tiled = jax.block_until_ready(feed_forward_reference(x3, w3, b3, w4, b4))
    err_tiled = float(jnp.max(jnp.abs(out_tiled - ref_tiled)))
    assert jnp.allclose(out_tiled, ref_tiled, atol=2e-5, rtol=2e-5), err_tiled

    print("KERNEL_OK")
</pallas_src>

<mosaic_0001>
module attributes {stable_mosaic.version = 11 : i64} {
  func.func @_ffn_fused_kernel(%arg0: i32, %arg1: memref<8x32xbf16, #tpu.memory_space<vmem>>, %arg2: memref<32x128xbf16, #tpu.memory_space<vmem>>, %arg3: memref<1x128xf32, #tpu.memory_space<vmem>>, %arg4: memref<128x32xbf16, #tpu.memory_space<vmem>>, %arg5: memref<1x32xf32, #tpu.memory_space<vmem>>, %arg6: memref<8x32xf32, #tpu.memory_space<vmem>>) attributes {dimension_semantics = [#tpu.dimension_semantics<parallel>], iteration_bounds = array<i64: 2>, scalar_prefetch = 0 : i64, scratch_operands = 0 : i64, tpu.core_type = #tpu.core_type<tc>, window_params = [{transform_indices = @transform_0, window_bounds = array<i64: 8, 32>}, {pipeline_mode = #tpu.pipeline_mode<synchronous>, transform_indices = @transform_1, window_bounds = array<i64: 32, 128>}, {pipeline_mode = #tpu.pipeline_mode<synchronous>, transform_indices = @transform_2, window_bounds = array<i64: 1, 128>}, {pipeline_mode = #tpu.pipeline_mode<synchronous>, transform_indices = @transform_3, window_bounds = array<i64: 128, 32>}, {pipeline_mode = #tpu.pipeline_mode<synchronous>, transform_indices = @transform_4, window_bounds = array<i64: 1, 32>}, {transform_indices = @transform_5, window_bounds = array<i64: 8, 32>}]} {
    %c0 = arith.constant 0 : index
    %c0_0 = arith.constant 0 : index
    %0 = vector.load %arg1[%c0, %c0_0] : memref<8x32xbf16, #tpu.memory_space<vmem>>, vector<8x32xbf16>
    %c0_1 = arith.constant 0 : index
    %c0_2 = arith.constant 0 : index
    %1 = vector.load %arg2[%c0_1, %c0_2] : memref<32x128xbf16, #tpu.memory_space<vmem>>, vector<32x128xbf16>
    %cst = arith.constant dense<0.000000e+00> : vector<8x128xf32>
    %2 = tpu.matmul %0, %1, %cst {dimension_numbers = #tpu.dot_dimension_numbers<[1], [0], [0], [1], [0, 0, 1, 1], [], []>} : vector<8x32xbf16>, vector<32x128xbf16>, vector<8x128xf32> -> vector<8x128xf32>
    %c0_3 = arith.constant 0 : index
    %c0_4 = arith.constant 0 : index
    %3 = vector.load %arg3[%c0_3, %c0_4] : memref<1x128xf32, #tpu.memory_space<vmem>>, vector<1x128xf32>
    %4 = vector.broadcast %3 : vector<1x128xf32> to vector<8x128xf32>
    %5 = arith.addf %2, %4 : vector<8x128xf32>
    %cst_5 = arith.constant 5.000000e-01 : f32
    %6 = vector.broadcast %cst_5 : f32 to vector<8x128xf32>
    %7 = arith.mulf %6, %5 : vector<8x128xf32>
    %cst_6 = arith.constant 0.707106769 : f32
    %8 = vector.broadcast %cst_6 : f32 to vector<8x128xf32>
    %9 = arith.mulf %5, %8 : vector<8x128xf32>
    %10 = math.erf %9 : vector<8x128xf32>
    %cst_7 = arith.constant 1.000000e+00 : f32
    %11 = vector.broadcast %cst_7 : f32 to vector<8x128xf32>
    %12 = arith.addf %11, %10 : vector<8x128xf32>
    %13 = arith.mulf %7, %12 : vector<8x128xf32>
    %14 = arith.truncf %13 : vector<8x128xf32> to vector<8x128xbf16>
    %c0_8 = arith.constant 0 : index
    %c0_9 = arith.constant 0 : index
    %15 = vector.load %arg4[%c0_8, %c0_9] : memref<128x32xbf16, #tpu.memory_space<vmem>>, vector<128x32xbf16>
    %cst_10 = arith.constant dense<0.000000e+00> : vector<8x32xf32>
    %16 = tpu.matmul %14, %15, %cst_10 {dimension_numbers = #tpu.dot_dimension_numbers<[1], [0], [0], [1], [0, 0, 1, 1], [], []>} : vector<8x128xbf16>, vector<128x32xbf16>, vector<8x32xf32> -> vector<8x32xf32>
    %c0_11 = arith.constant 0 : index
    %c0_12 = arith.constant 0 : index
    %17 = vector.load %arg5[%c0_11, %c0_12] : memref<1x32xf32, #tpu.memory_space<vmem>>, vector<1x32xf32>
    %18 = vector.broadcast %17 : vector<1x32xf32> to vector<8x32xf32>
    %19 = arith.addf %16, %18 : vector<8x32xf32>
    %c0_13 = arith.constant 0 : index
    %c0_14 = arith.constant 0 : index
    %20 = vector.load %arg6[%c0_13, %c0_14] : memref<8x32xf32, #tpu.memory_space<vmem>>, vector<8x32xf32>
    tpu.vector_store %arg6[%c0_13, %c0_14], %19 {strides = array<i32>} : memref<8x32xf32, #tpu.memory_space<vmem>>, vector<8x32xf32>,
    return
  }
  func.func @transform_0(%arg0: i32) -> (i32, i32) {
    %c0_i32 = arith.constant 0 : i32
    %c0_i32_0 = arith.constant 0 : i32
    return %arg0, %c0_i32 : i32, i32
  }
  func.func @transform_1(%arg0: i32) -> (i32, i32) {
    %c0_i32 = arith.constant 0 : i32
    %c0_i32_0 = arith.constant 0 : i32
    %c0_i32_1 = arith.constant 0 : i32
    return %c0_i32, %c0_i32_0 : i32, i32
  }
  func.func @transform_2(%arg0: i32) -> (i32, i32) {
    %c0_i32 = arith.constant 0 : i32
    %c0_i32_0 = arith.constant 0 : i32
    %c0_i32_1 = arith.constant 0 : i32
    return %c0_i32, %c0_i32_0 : i32, i32
  }
  func.func @transform_3(%arg0: i32) -> (i32, i32) {
    %c0_i32 = arith.constant 0 : i32
    %c0_i32_0 = arith.constant 0 : i32
    %c0_i32_1 = arith.constant 0 : i32
    return %c0_i32, %c0_i32_0 : i32, i32
  }
  func.func @transform_4(%arg0: i32) -> (i32, i32) {
    %c0_i32 = arith.constant 0 : i32
    %c0_i32_0 = arith.constant 0 : i32
    %c0_i32_1 = arith.constant 0 : i32
    return %c0_i32, %c0_i32_0 : i32, i32
  }
  func.func @transform_5(%arg0: i32) -> (i32, i32) {
    %c0_i32 = arith.constant 0 : i32
    %c0_i32_0 = arith.constant 0 : i32
    return %arg0, %c0_i32 : i32, i32
  }
}

</mosaic_0001>

<bundles_post_ra>
// kernel: feed_forward.1
= control target key start
LH: loop header
LB: loop body
LE: loop exit
PB: predicated region body
PF: predicated region fallthrough
CT: control target
= control target key end

     0   :  { %10 = vsyncpa [#allocation3], 0  ;;  %s831_s0 = inlined_call_operand.vmem [shape: bf16[16,32], index: 0, kind: input, shape index: {}]   ;;  %s832_s1 = inlined_call_operand.vmem [shape: bf16[32,128], index: 1, kind: input, shape index: {}]   ;;  %s833_s2 = inlined_call_operand.vmem [shape: f32[1,128], index: 2, kind: input, shape index: {}]   ;;  %s834_s3 = inlined_call_operand.vmem [shape: bf16[128,32], index: 3, kind: input, shape index: {}]   ;;  %s835_s4 = inlined_call_operand.vmem [shape: f32[1,32], index: 4, kind: input, shape index: {}]   ;;  %s836_s5 = inlined_call_operand.hbm [shape: f32[16,32], index: 5, kind: output, shape index: {}]  }
   0x1   :  { %12 = vsyncpa [#allocation3 + $0x1], 0  ;;  %s693_s18 = smov 0   ;;  %s695_s19 = smov 0  }
   0x2   :  { %s697_s20 = smov 0   ;;  %s699_s21 = smov 0  }
   0x3 LB: > { %s714_s22 = sadd.s32 4294967295, %s658_s21   ;;  %s480_s23 = sadd.s32 4294967294, %s658_s21   ;;  %s658_s21 = sphi %s699_s21, %s842_s21   ;;  %s654_s20 = sphi %s697_s20, %s841_s20   ;;  %s650_s19 = sphi %s695_s19, %s840_s19   ;;  %s646_s18 = sphi %s693_s18, %s839_s18  }
   0x4   : > { %s718_s24 = sadd.s32 1, %s658_s21   ;;  %s135_s25 = sadd.s32 1, %s654_s20 }
   0x5   : > { %s132_s26 = ssub.s32 %s658_s21, %s718_s24  ;;  %p145_p0 = scmp.ne.s32.totalorder %s654_s20, %s650_s19 }
   0x6   : > { %p133_p1 = scmp.eq.s32.totalorder %s132_s26, 0  ;;  %p146_p2 = scmp.eq.s32.totalorder %s714_s22, 1 }
   0x7   : > { %p151_p3 = scmp.ne.s32.totalorder %s650_s19, %s646_s18  ;;  %p152_p4 = scmp.eq.s32.totalorder %s480_s23, 1 }
   0x8   : > { %s729_s27 = scalar_select %p133_p1, %s654_s20, %s135_s25  }
   0x9   : > { %p731_p5 = por %p146_p2, %p145_p0  ;;  %p735_p6 = por %p152_p4, %p151_p3 }
   0xa   : > { %p483_p7 = scmp.ge.s32.totalorder %s658_s21, 1  ;;  %p189_p8 = scmp.lt.s32.totalorder %s658_s21, 3 }
   0xc   : > { %p190_p9 = pnand %p483_p7, %p189_p8 }
   0xd   : > { %v584_v0 = vld [vmem:[%s832_s1] sm:$0xff] (!%p190_p9)   ;;  %v660_v1 = vmov (!%p190_p9), 0.0   ;;  %v585_v2 = vld [vmem:[%s832_s1 + $0x8] sm:$0xff] (!%p190_p9)   ;;  %vm661_vm0 = vmmov (!%p190_p9), 0   ;;  %p216_p10 = scmp.lt.s32.totalorder (!%p190_p9), %s714_s22, 1  ;;  %vm245_vm1 = vcmask (!%p190_p9), 261120  }
   0xe   : > { %193 = sbr.rel (%p190_p9) target bundleno = 487 (0x1e7), region = 40  ;;  %515 = vmatprep.subr.bf16.mxu0 (!%p190_p9), %v660_v1  ;;  %523 = vmatprep.subr.bf16.mxu1 (!%p190_p9), %v660_v1  ;;  %v586_v3 = vld [vmem:[%s834_s3] sm:$0xff] (!%p190_p9)   ;;  %v587_v4 = vld [vmem:[%s834_s3 + $0x8] sm:$0xff] (!%p190_p9)   ;;  %v588_v6 = vld [vmem:[%s834_s3 + $0x10] sm:$0xff] (!%p190_p9)   ;;  %s213_s16 = sand.u32 (!%p190_p9), 1, %s650_s19  }
   0xf   : > { %516 = vmatpush3.bf16.msra.mxu0 (!%p190_p9), %v584_v0  ;;  %519 = vmatprep.mubr.msk.bf16.mxu0 (!%p190_p9), %vm661_vm0, %v660_v1  ;;  %v589_v7 = vld [vmem:[%s834_s3 + $0x18] sm:$0xff] (!%p190_p9)   ;;  %v590_v8 = vld [vmem:[%s834_s3 + $0x20] sm:$0xff] (!%p190_p9)   ;;  %v591_v9 = vld [vmem:[%s834_s3 + $0x28] sm:$0xff] (!%p190_p9)   ;;  %s500_s26 = sshll.u32 (!%p190_p9), %s714_s22, 7 }
  0x10   : > { %517 = vmatprep.subr.bf16.mxu0 (!%p190_p9), %v660_v1  ;;  %539 = vmatprep.mubr.msk.bf16.mxu1 (!%p190_p9), %vm661_vm0, %v660_v1  ;;  %v592_v10 = vld [vmem:[%s834_s3 + $0x30] sm:$0xff] (!%p190_p9)   ;;  %v593_v11 = vld [vmem:[%s834_s3 + $0x38] sm:$0xff] (!%p190_p9)   ;;  %v486_v12 = vld [vmem:[%s833_s2] ss:$0 sm:$0xff] (!%p190_p9)  ;;  %s788_s9 = scalar_lea.hbm (!%p190_p9), %s836_s5, %s500_s26 }
  0x11   : > { %524 = vmatpush3.bf16.msra.mxu1 (!%p190_p9), %v586_v3  ;;  %v490_v24 = vld [vmem:[%s835_s4] ss:$0 sm:$0xff] (!%p190_p9) }
  0x12   : > { %525 = vmatprep.subr.bf16.mxu1 (!%p190_p9), %v660_v1 }
  0x13   : > { %518 = vmatpush3.bf16.msra.mxu0 (!%p190_p9), %v585_v2 }
  0x15   : > { %s217_s11 = scalar_select %p216_p10, %s714_s22, 1  ;;  %526 = vmatpush3.bf16.msra.mxu1 %v587_v4 }
  0x16   : > { %527 = vmatprep.subr.bf16.mxu1 %v660_v1  ;;  %s408_s22 = scalar_lea.sflag [#allocation3], %s213_s16 }
  0x17   : > { %s485_s14 = sshll.u32 %s217_s11, 2  ;;  %s662_s11 = smov [#allocation2]  }
  0x18   : > { %s219_s17 = scalar_lea.vmem %s831_s0, %s485_s14  ;;  %s600_s12 = sshll.u32 %s662_s11, 4  ;;  %s601_s12 = int_to_ptr.vmem [resolvable:$false] %s600_s12 }
  0x19   : > { %v221_v5 = vld [vmem:[%s219_s17] sm:$0xf]  ;;  %528 = vmatpush3.bf16.msra.mxu1 %v588_v6  ;;  %s484_s17 = sshll.u32 %s213_s16, 3  ;;  %s602_s13 = scalar_lea.vmem %s601_s12, 256 }
  0x1a   : > { %520 = vmatmul.mubr.msk.bf16.vlgmr.msra.gmra.mrb[0].mxu0 %vm245_vm1, %v221_v5  ;;  %529 = vmatprep.subr.bf16.mxu1 %v660_v1  ;;  %s215_s30 = scalar_lea.vmem [#allocation2], %s484_s17 }
  0x1b   : > { %s421_s6 = sshll.u32 %s215_s30, 4  ;;  %s790_s6 = int_to_ptr.vmem [resolvable:$true] %s421_s6 }
  0x1c   : > { %s596_s10 = scalar_lea.vmem %s790_s6, 128  ;;  %p603_p0 = scmp.lt.s32.totalorder %s790_s6, %s601_s12 }
  0x1d   : > { %530 = vmatpush3.bf16.msra.mxu1 %v589_v7  ;;  %p597_p11 = scmp.ne.s32.totalorder %s790_s6, %s596_s10  ;;  %p604_p1 = scmp.lt.s32.totalorder %s602_s13, %s596_s10 }
  0x1e   : > { %531 = vmatprep.subr.bf16.mxu1 %v660_v1 }
  0x1f   : > { %p598_p12 = pnand %p597_p11, %p731_p5  ;;  %p605_p2 = por %p604_p1, %p603_p0 }
  0x21   : > { %532 = vmatpush3.bf16.msra.mxu1 %v590_v8  ;;  %p599_p13 = pneg %p598_p12 }
  0x22   : > { %533 = vmatprep.subr.bf16.mxu1 %v660_v1 }
  0x23   : > { %p606_p3 = pnand %p605_p2, %p599_p13 }
  0x25   : > { %534 = vmatpush3.bf16.msra.mxu1 %v591_v9 }
  0x26   : > { %535 = vmatprep.subr.bf16.mxu1 %v660_v1 }
  0x29   : > { %536 = vmatpush3.bf16.msra.mxu1 %v592_v10 }
  0x2a   : > { %537 = vmatprep.subr.bf16.mxu1 %v660_v1 }
  0x2d   : > { %538 = vmatpush3.bf16.msra.mxu1 %v593_v11 }
  0xed   : > { %v283_v13 = vpop.f32.mrb[0].mxu0 }
  0xee   : > { %v284_v14 = vadd.f32 %v486_v12, %v283_v13  ;;  %v521_v15 = vpop.f32.mrb[1].mxu0 }
  0xef   : > { %v286_v16 = vpop.f32.mrb[2].mxu0 }
  0xf0   : > { %v290_v17 = vmul.f32 0.70710677, %v284_v14  ;;  %v522_v18 = vpop.f32.mrb[3].mxu0  ;;  %v289_v20 = vmul.f32 0.5, %v284_v14 }
  0xf2   : > { %594 = verf.f32 %v290_v17 }
  0xfc   : > { %v595_v19 = vpop.eup %594 }
  0xfd   : > { %v292_v21 = vadd.f32 1.0, %v595_v19 }
  0xff   : > { %v293_v22 = vmul.f32 %v292_v21, %v289_v20 }
 0x101   : > { %v294_v23 = vpack.c.bf16 %v293_v22, %v293_v22 }
 0x103   : > { %540 = vmatmul.mubr.bf16.vlgmr.msra.gmra.mrb[0].mxu1 %v294_v23 }
 0x1d6   : > { %v400_v25 = vpop.f32.mrb[0].mxu1 }
 0x1d7   : > { %v401_v26 = vadd.f32 %v490_v24, %v400_v25  ;;  %v541_v27 = vpop.f32.mrb[1].mxu1 }
 0x1d8   : > { %v403_v28 = vpop.f32.mrb[2].mxu1 }
 0x1d9   : > { %v542_v29 = vpop.f32.mrb[3].mxu1  ;;  %406 = vst.msk [vmem:[%s215_s30] sm:$0xff] %vm245_vm1, %v401_v26 }
 0x1da   : > { %609 = shalt.err (!%p606_p3)
}
 0x1db   : > { %s610_s14 = scalar_lea.hbm %s788_s9, 128  ;;  %s614_s17 = scalar_lea.hbm %s836_s5, 256 }
 0x1dc   : > { %p611_p4 = scmp.ne.s32.totalorder %s788_s9, %s610_s14  ;;  %p615_p9 = scmp.lt.u32.totalorder %s788_s9, %s836_s5 }
 0x1dd   : > { %p616_p10 = scmp.lt.u32.totalorder %s614_s17, %s610_s14  ;;  %p618_p12 = scmp.lt.u32.totalorder %s610_s14, %s788_s9 }
 0x1de   : > { %p612_p7 = pnand %p611_p4, %p731_p5 }
 0x1df   : > { %p617_p11 = por %p616_p10, %p615_p9 }
 0x1e0   : > { %p613_p8 = pneg %p612_p7 }
 0x1e1   : > { %p619_p13 = por %p618_p12, %p617_p11 }
 0x1e3   : > { %p620_p0 = pnand %p619_p13, %p613_p8 }
 0x1e5   : > { %623 = shalt.err (!%p620_p0)
}
 0x1e6   : > { %543 = dma.vmem_to_hbm [thread:$0]  (%p731_p5), %s790_s6, 128, %s788_s9, %s408_s22  }
 0x1e7 PF: > { %p549_p1 = scmp.ge.s32.totalorder %s658_s21, 2  ;;  %s433_s26 = sand.u32 1, %s646_s18  }
 0x1e8   : > { %s434_s30 = scalar_lea.sflag [#allocation3], %s433_s26 }
 0x1e9   : > { %p546_p2 = pnand %p549_p1, %p735_p6 }
 0x1eb   : > { %641 = dma.done.wait (!%p546_p2), %s434_s30, 128  }
 0x1ec   : > { %643 = vsyncadd (!%p546_p2), %s434_s30, 4294967168  ;;  %p15_p3 = scmp.ge.s32.totalorder %s718_s24, 4   ;;  %s839_s18 = smov %s650_s19 }
 0x1ed   : > { %s840_s19 = smov %s654_s20  ;;  %s841_s20 = smov %s729_s27 }
 0x1ee   : > { %s842_s21 = smov %s718_s24  ;;  %17 = sbr.rel (!%p15_p3) target bundleno = 3 (0x3), region = 75 }
 0x1f5   :  { %439 = vsyncpa [#allocation3], 1 }
 0x1f6   :  { %441 = vsyncpa [#allocation3 + $0x1], 1 }

</bundles_post_ra>
